<compile_context>
chip_gen: v6e
topology: v6e:2x2x1
jax: 0.10.0
libtpu: 0.0.40
codegen_flags: <defaults>
</compile_context>

<pallas_src>
import jax
import jax.numpy as jnp
from jax.experimental import pallas as pl
from jax.experimental.pallas import tpu as pltpu


def _mlp_decoder_kernel(l_ref, r_ref, w1l_ref, w1r_ref, b1_ref, w2_ref, b2_ref,
                        o_ref):
    left = l_ref[...]          # (TILE_N, C)
    right = r_ref[...]         # (TILE_N, C)

    # lin1 on the implicitly concatenated input (concat folded into two matmuls).
    hidden = jnp.dot(left, w1l_ref[...], preferred_element_type=jnp.float32)
    hidden = hidden + jnp.dot(right, w1r_ref[...],
                              preferred_element_type=jnp.float32)
    hidden = jnp.maximum(hidden + b1_ref[...], 0.0)        # (TILE_N, H), f32

    # lin2, produced directly in lane-dense orientation:
    #   (1, H) contracted with (TILE_N, H) over H  ->  (1, TILE_N)
    out_row = jnp.einsum('oh,nh->on', w2_ref[...], hidden,
                         preferred_element_type=jnp.float32)
    out_row = out_row + b2_ref[0]                           # scalar bias (SMEM)

    o_ref[...] = out_row.reshape(o_ref.shape).astype(o_ref.dtype)


def mlp_decoder(left, right, w1, b1, w2, b2, *, tile_n=512):
    """left, right: (N, C). w1: (2C, H), b1: (H,), w2: (H, 1), b2: (1,).

    Returns (N,) float32, matching torch's `z.view(-1)`.
    Weights are stored (in_features, out_features), i.e. transposed relative to
    torch.nn.Linear's (out, in) storage.
    """
    n, c = left.shape
    h = w1.shape[1]

    # Single full block when N is small; otherwise tile N and rely on Pallas
    # boundary blocks for the ragged tail.
    if n <= tile_n:
        tile_n = n
    g = pl.cdiv(n, tile_n)

    # Split W1 so the concat never materializes.
    w1_left = w1[:c, :]                    # (C, H)
    w1_right = w1[c:, :]                   # (C, H)
    b1_2d = b1.reshape(1, h)               # (1, H)
    w2_row = w2.reshape(1, h)              # (1, H)  == w2.T
    b2_1d = b2.reshape(1)                  # (1,)  -> SMEM scalar

    itemsize = jnp.dtype(left.dtype).itemsize
    flops = 2 * n * (2 * c) * h + 2 * n * h
    bytes_accessed = (2 * n * c) * itemsize + n * 4 + (2 * c * h + 2 * h + 1) * 4

    out = pl.pallas_call(
        _mlp_decoder_kernel,
        out_shape=jax.ShapeDtypeStruct((g, 1, tile_n), jnp.float32),
        grid_spec=pltpu.PrefetchScalarGridSpec(
            num_scalar_prefetch=0,
            grid=(g,),
            in_specs=[
                pl.BlockSpec((tile_n, c), lambda i: (i, 0)),   # left rows
                pl.BlockSpec((tile_n, c), lambda i: (i, 0)),   # right rows
                pl.BlockSpec((c, h), lambda i: (0, 0)),        # W1 left half
                pl.BlockSpec((c, h), lambda i: (0, 0)),        # W1 right half
                pl.BlockSpec((1, h), lambda i: (0, 0)),        # b1
                pl.BlockSpec((1, h), lambda i: (0, 0)),        # w2 (as row)
                pl.BlockSpec(memory_space=pltpu.MemorySpace.SMEM),  # b2 scalar
            ],
            out_specs=pl.BlockSpec((1, 1, tile_n), lambda i: (i, 0, 0)),
        ),
        compiler_params=pltpu.CompilerParams(
            dimension_semantics=("parallel",),
            vmem_limit_bytes=32 * 1024 * 1024,
        ),
        cost_estimate=pl.CostEstimate(
            flops=flops, transcendentals=0, bytes_accessed=bytes_accessed),
    )(left, right, w1_left, w1_right, b1_2d, w2_row, b2_1d)

    # Flatten the lane-dense slab and drop the padded tail of the last tile.
    return out.reshape(-1)[:n]


def init_params(key, in_channels, hidden_channels):
    """Deterministic init mimicking torch.nn.Linear's U(-1/sqrt(fan_in), 1/sqrt(fan_in))."""
    k1, k2, k3, k4 = jax.random.split(key, 4)
    fan1 = 2 * in_channels
    bound1 = 1.0 / (fan1 ** 0.5)
    w1 = jax.random.uniform(k1, (2 * in_channels, hidden_channels),
                            jnp.float32, -bound1, bound1)
    b1 = jax.random.uniform(k2, (hidden_channels,), jnp.float32, -bound1, bound1)
    fan2 = hidden_channels
    bound2 = 1.0 / (fan2 ** 0.5)
    w2 = jax.random.uniform(k3, (hidden_channels, 1), jnp.float32, -bound2, bound2)
    b2 = jax.random.uniform(k4, (1,), jnp.float32, -bound2, bound2)
    return w1, b1, w2, b2


if __name__ == "__main__":
    # Small-but-tiled shapes: N edges (ragged vs. tile size on purpose),
    # in_channels=8, hidden_channels=32.
    N, C, H = 2000, 8, 32
    key = jax.random.PRNGKey(0)
    k_l, k_r, k_p = jax.random.split(key, 3)
    left = jax.random.normal(k_l, (N, C), jnp.float32)
    right = jax.random.normal(k_r, (N, C), jnp.float32)
    w1, b1, w2, b2 = init_params(k_p, C, H)

    out = mlp_decoder(left, right, w1, b1, w2, b2, tile_n=512)
    jax.block_until_ready(out)

    # Pure-JAX reference (same math as the PyTorch forward).
    z = jnp.concatenate([left, right], axis=-1)
    ref = (jnp.maximum(z @ w1 + b1, 0.0) @ w2 + b2).reshape(-1)
    assert out.shape == (N,)
    assert jnp.allclose(out, ref, atol=1e-5, rtol=1e-5)

    print("KERNEL_OK")
</pallas_src>

<mosaic_0001>
module attributes {stable_mosaic.version = 11 : i64} {
  func.func @_mlp_decoder_kernel(%arg0: i32, %arg1: memref<512x8xf32, #tpu.memory_space<vmem>>, %arg2: memref<512x8xf32, #tpu.memory_space<vmem>>, %arg3: memref<8x32xf32, #tpu.memory_space<vmem>>, %arg4: memref<8x32xf32, #tpu.memory_space<vmem>>, %arg5: memref<1x32xf32, #tpu.memory_space<vmem>>, %arg6: memref<1x32xf32, #tpu.memory_space<vmem>>, %arg7: memref<1xf32, #tpu.memory_space<smem>>, %arg8: memref<1x1x512xf32, #tpu.memory_space<vmem>>) attributes {dimension_semantics = [#tpu.dimension_semantics<parallel>], iteration_bounds = array<i64: 4>, scalar_prefetch = 0 : i64, scratch_operands = 0 : i64, tpu.core_type = #tpu.core_type<tc>, window_params = [{transform_indices = @transform_0, window_bounds = array<i64: 512, 8>}, {transform_indices = @transform_1, window_bounds = array<i64: 512, 8>}, {pipeline_mode = #tpu.pipeline_mode<synchronous>, transform_indices = @transform_2, window_bounds = array<i64: 8, 32>}, {pipeline_mode = #tpu.pipeline_mode<synchronous>, transform_indices = @transform_3, window_bounds = array<i64: 8, 32>}, {pipeline_mode = #tpu.pipeline_mode<synchronous>, transform_indices = @transform_4, window_bounds = array<i64: 1, 32>}, {pipeline_mode = #tpu.pipeline_mode<synchronous>, transform_indices = @transform_5, window_bounds = array<i64: 1, 32>}, {transform_indices = @transform_6, window_bounds = array<i64: 1>}, {transform_indices = @transform_7, window_bounds = array<i64: 1, 1, 512>}]} {
    %c0 = arith.constant 0 : index
    %c0_0 = arith.constant 0 : index
    %0 = vector.load %arg1[%c0, %c0_0] : memref<512x8xf32, #tpu.memory_space<vmem>>, vector<512x8xf32>
    %c0_1 = arith.constant 0 : index
    %c0_2 = arith.constant 0 : index
    %1 = vector.load %arg2[%c0_1, %c0_2] : memref<512x8xf32, #tpu.memory_space<vmem>>, vector<512x8xf32>
    %c0_3 = arith.constant 0 : index
    %c0_4 = arith.constant 0 : index
    %2 = vector.load %arg3[%c0_3, %c0_4] : memref<8x32xf32, #tpu.memory_space<vmem>>, vector<8x32xf32>
    %cst = arith.constant dense<0.000000e+00> : vector<512x32xf32>
    %3 = tpu.matmul %0, %2, %cst {dimension_numbers = #tpu.dot_dimension_numbers<[1], [0], [0], [1], [0, 0, 1, 1], [], []>} : vector<512x8xf32>, vector<8x32xf32>, vector<512x32xf32> -> vector<512x32xf32>
    %c0_5 = arith.constant 0 : index
    %c0_6 = arith.constant 0 : index
    %4 = vector.load %arg4[%c0_5, %c0_6] : memref<8x32xf32, #tpu.memory_space<vmem>>, vector<8x32xf32>
    %cst_7 = arith.constant dense<0.000000e+00> : vector<512x32xf32>
    %5 = tpu.matmul %1, %4, %cst_7 {dimension_numbers = #tpu.dot_dimension_numbers<[1], [0], [0], [1], [0, 0, 1, 1], [], []>} : vector<512x8xf32>, vector<8x32xf32>, vector<512x32xf32> -> vector<512x32xf32>
    %6 = arith.addf %3, %5 : vector<512x32xf32>
    %c0_8 = arith.constant 0 : index
    %c0_9 = arith.constant 0 : index
    %7 = vector.load %arg5[%c0_8, %c0_9] : memref<1x32xf32, #tpu.memory_space<vmem>>, vector<1x32xf32>
    %8 = vector.broadcast %7 : vector<1x32xf32> to vector<512x32xf32>
    %9 = arith.addf %6, %8 : vector<512x32xf32>
    %cst_10 = arith.constant 0.000000e+00 : f32
    %10 = vector.broadcast %cst_10 : f32 to vector<512x32xf32>
    %11 = arith.maximumf %9, %10 : vector<512x32xf32>
    %c0_11 = arith.constant 0 : index
    %c0_12 = arith.constant 0 : index
    %12 = vector.load %arg6[%c0_11, %c0_12] : memref<1x32xf32, #tpu.memory_space<vmem>>, vector<1x32xf32>
    "tpu.trace_start"() <{level = 10 : i32, message = "oh,nh->on"}> : () -> ()
    %cst_13 = arith.constant dense<0.000000e+00> : vector<1x512xf32>
    %13 = tpu.matmul %12, %11, %cst_13 {dimension_numbers = #tpu.dot_dimension_numbers<[1], [1], [0], [0], [0, 0, 1, 0], [], []>} : vector<1x32xf32>, vector<512x32xf32>, vector<1x512xf32> -> vector<1x512xf32>
    "tpu.trace_stop"() : () -> ()
    %c0_14 = arith.constant 0 : index
    %14 = memref.load %arg7[%c0_14] : memref<1xf32, #tpu.memory_space<smem>>
    %15 = vector.broadcast %14 : f32 to vector<1x512xf32>
    %16 = arith.addf %13, %15 : vector<1x512xf32>
    %17 = vector.shape_cast %16 : vector<1x512xf32> to vector<1x1x512xf32>
    %c0_15 = arith.constant 0 : index
    %c0_16 = arith.constant 0 : index
    %c0_17 = arith.constant 0 : index
    %18 = vector.load %arg8[%c0_15, %c0_16, %c0_17] : memref<1x1x512xf32, #tpu.memory_space<vmem>>, vector<1x1x512xf32>
    tpu.vector_store %arg8[%c0_15, %c0_16, %c0_17], %17 {strides = array<i32>} : memref<1x1x512xf32, #tpu.memory_space<vmem>>, vector<1x1x512xf32>,
    return
  }
  func.func @transform_0(%arg0: i32) -> (i32, i32) {
    %c0_i32 = arith.constant 0 : i32
    %c0_i32_0 = arith.constant 0 : i32
    return %arg0, %c0_i32 : i32, i32
  }
  func.func @transform_1(%arg0: i32) -> (i32, i32) {
    %c0_i32 = arith.constant 0 : i32
    %c0_i32_0 = arith.constant 0 : i32
    return %arg0, %c0_i32 : i32, i32
  }
  func.func @transform_2(%arg0: i32) -> (i32, i32) {
    %c0_i32 = arith.constant 0 : i32
    %c0_i32_0 = arith.constant 0 : i32
    %c0_i32_1 = arith.constant 0 : i32
    return %c0_i32, %c0_i32_0 : i32, i32
  }
  func.func @transform_3(%arg0: i32) -> (i32, i32) {
    %c0_i32 = arith.constant 0 : i32
    %c0_i32_0 = arith.constant 0 : i32
    %c0_i32_1 = arith.constant 0 : i32
    return %c0_i32, %c0_i32_0 : i32, i32
  }
  func.func @transform_4(%arg0: i32) -> (i32, i32) {
    %c0_i32 = arith.constant 0 : i32
    %c0_i32_0 = arith.constant 0 : i32
    %c0_i32_1 = arith.constant 0 : i32
    return %c0_i32, %c0_i32_0 : i32, i32
  }
  func.func @transform_5(%arg0: i32) -> (i32, i32) {
    %c0_i32 = arith.constant 0 : i32
    %c0_i32_0 = arith.constant 0 : i32
    %c0_i32_1 = arith.constant 0 : i32
    return %c0_i32, %c0_i32_0 : i32, i32
  }
  func.func @transform_6(%arg0: i32) -> i32 {
    %c0_i32 = arith.constant 0 : i32
    %c0_i32_0 = arith.constant 0 : i32
    return %c0_i32 : i32
  }
  func.func @transform_7(%arg0: i32) -> (i32, i32, i32) {
    %c0_i32 = arith.constant 0 : i32
    %c0_i32_0 = arith.constant 0 : i32
    %c0_i32_1 = arith.constant 0 : i32
    return %arg0, %c0_i32, %c0_i32_0 : i32, i32, i32
  }
}

</mosaic_0001>

<bundles_post_ra>
// kernel: tpu_custom_call.1
= control target key start
LH: loop header
LB: loop body
LE: loop exit
PB: predicated region body
PF: predicated region fallthrough
CT: control target
= control target key end

     0   :  { %s3685_s0 = inlined_call_operand.vmem [shape: f32[2000,8], index: 0, kind: input, shape index: {}]   ;;  %s3686_s1 = inlined_call_operand.vmem [shape: f32[2000,8], index: 1, kind: input, shape index: {}]   ;;  %s3687_s2 = inlined_call_operand.vmem [shape: f32[8,32], index: 2, kind: input, shape index: {}]   ;;  %s3688_s3 = inlined_call_operand.vmem [shape: f32[8,32], index: 3, kind: input, shape index: {}]   ;;  %s3689_s4 = inlined_call_operand.vmem [shape: f32[1,32], index: 4, kind: input, shape index: {}]   ;;  %s3690_s5 = inlined_call_operand.vmem [shape: f32[1,32], index: 5, kind: input, shape index: {}]   ;;  %s3691_s6 = inlined_call_operand.<no memory space> [shape: f32[1], index: 6, kind: input, shape index: {}]   ;;  %s3692_s7 = inlined_call_operand.hbm [shape: f32[4,1,512], index: 7, kind: output, shape index: {}]  }
   0x1   :  { %12 = sst [smem:[#allocation2]] %s3691_s6 }
   0x2   :  { %13 = vsyncpa [#allocation4], 0 }
   0x3   :  { %15 = vsyncpa [#allocation4 + $0x1], 0  ;;  %s2974_s26 = smov 0   ;;  %s2976_s27 = smov 0  }
   0x4   :  { %s2978_s28 = smov 0   ;;  %s2980_s29 = smov 0  }
   0x5 LB: > { %s2222_s6 = sadd.s32 4294967295, %s2927_s29   ;;  %s2223_s30 = sadd.s32 4294967294, %s2927_s29   ;;  %s2927_s29 = sphi %s2980_s29, %s3698_s29   ;;  %s2923_s28 = sphi %s2978_s28, %s3697_s28   ;;  %s2919_s27 = sphi %s2976_s27, %s3696_s27   ;;  %s2915_s26 = sphi %s2974_s26, %s3695_s26  }
   0x6   : > { %s2997_s8 = sadd.s32 1, %s2927_s29   ;;  %s185_s9 = sadd.s32 1, %s2923_s28 }
   0x7   : > { %s182_s10 = ssub.s32 %s2927_s29, %s2997_s8  ;;  %p195_p0 = scmp.ne.s32.totalorder %s2923_s28, %s2919_s27 }
   0x8   : > { %p183_p1 = scmp.eq.s32.totalorder %s182_s10, 0  ;;  %p196_p2 = scmp.eq.s32.totalorder %s2222_s6, 3 }
   0x9   : > { %p201_p3 = scmp.ne.s32.totalorder %s2919_s27, %s2915_s26  ;;  %p202_p4 = scmp.eq.s32.totalorder %s2223_s30, 3 }
   0xa   : > { %s3007_s11 = scalar_select %p183_p1, %s2923_s28, %s185_s9  }
   0xb   : > { %p3009_p5 = por %p196_p2, %p195_p0  ;;  %p3013_p6 = por %p202_p4, %p201_p3 }
   0xc   : > { %p2226_p7 = scmp.ge.s32.totalorder %s2927_s29, 1  ;;  %p269_p8 = scmp.lt.s32.totalorder %s2927_s29, 5 }
   0xe   : > { %p270_p9 = pnand %p2226_p7, %p269_p8 }
   0xf   : > { %s3025_s18 = sshll.u32 (!%p270_p9), %s2222_s6, 6  ;;  %s1763_s15 = sld [smem:[#allocation2]] (!%p270_p9) }
  0x10   : > { %273 = sbr.rel (%p270_p9) target bundleno = 633 (0x279), region = 48  ;;  %p319_p10 = scmp.lt.s32.totalorder (!%p270_p9), %s3025_s18, 249 }
  0x11   : > { %s311_s16 = sand.u32 (!%p270_p9), 1, %s2919_s27  }
  0x12   : > { %s2227_s17 = sshll.u32 (!%p270_p9), %s311_s16, 2  ;;  %s2138_s24 = scalar_lea.sflag (!%p270_p9), [#allocation4], %s311_s16 }
  0x15   : > { %v471_v0 = vld [vmem:[%s3688_s3] sm:$0xff]  ;;  %s320_s19 = scalar_select %p319_p10, %s3025_s18, 249  ;;  %vm472_vm0 = vcmask 64512   ;;  %vm1765_vm1 = vcmask 261120  }
  0x16   : > { %v470_v1 = vld [vmem:[%s3687_s2] sm:$0xff]  ;;  %2631 = vmatprep.subr.mxu0 %v471_v0 }
  0x17   : > { %2729 = vmatprep.subr.mxu1 %v470_v1  ;;  %2632 = vmatpush3.msra.mxu0 %v471_v0  ;;  %s2229_s20 = sshll.u32 %s320_s19, 3  ;;  %s313_s19 = scalar_lea.vmem [#allocation3], %s2227_s17 }
  0x18   : > { %2730 = vmatpush3.msra.mxu1 %v470_v1  ;;  %s3032_s23 = scalar_lea.vmem %s3686_s1, %s2229_s20  ;;  %s3037_s6 = scalar_lea.vmem %s3685_s0, %s2229_s20 }
  0x19   : > { %v406_v2 = vld [vmem:[%s3032_s23] sm:$0xff]  ;;  %v407_v4 = vld [vmem:[%s3032_s23 + $0x8] sm:$0xff]  ;;  %v408_v6 = vld [vmem:[%s3032_s23 + $0x10] sm:$0xff]  ;;  %s2152_s20 = sshll.u32 %s313_s19, 4  ;;  %s2153_s20 = int_to_ptr.vmem [resolvable:$true] %s2152_s20 }
  0x1a   : > { %v342_v3 = vld [vmem:[%s3037_s6] sm:$0xff]  ;;  %2633 = vmatprep.mubr.msk.f32.mxu0 %vm472_vm0, %v406_v2  ;;  %v343_v5 = vld [vmem:[%s3037_s6 + $0x8] sm:$0xff]  ;;  %v344_v7 = vld [vmem:[%s3037_s6 + $0x10] sm:$0xff]  ;;  %s2867_s25 = scalar_lea.vmem %s2153_s20, 64 }
  0x1b   : > { %2731 = vmatprep.mubr.msk.f32.mxu1 %vm472_vm0, %v342_v3  ;;  %2634 = vmatmul.mubr.msk.f32.vlgmr.msra.gmra.mxu0 %vm472_vm0, %v407_v4  ;;  %v409_v8 = vld [vmem:[%s3032_s23 + $0x18] sm:$0xff]  ;;  %v410_v10 = vld [vmem:[%s3032_s23 + $0x20] sm:$0xff]  ;;  %v411_v12 = vld [vmem:[%s3032_s23 + $0x28] sm:$0xff]  ;;  %p2868_p11 = scmp.ne.s32.totalorder %s2153_s20, %s2867_s25 }
  0x1c   : > { %2732 = vmatmul.mubr.msk.f32.vlgmr.msra.gmra.mxu1 %vm472_vm0, %v343_v5  ;;  %2636 = vmatprep.mubr.msk.f32.mxu0 %vm472_vm0, %v408_v6  ;;  %v345_v9 = vld [vmem:[%s3037_s6 + $0x18] sm:$0xff]  ;;  %v346_v11 = vld [vmem:[%s3037_s6 + $0x20] sm:$0xff]  ;;  %v347_v13 = vld [vmem:[%s3037_s6 + $0x28] sm:$0xff] }
  0x1d   : > { %2734 = vmatprep.mubr.msk.f32.mxu1 %vm472_vm0, %v344_v7  ;;  %v412_v14 = vld [vmem:[%s3032_s23 + $0x30] sm:$0xff]  ;;  %v413_v16 = vld [vmem:[%s3032_s23 + $0x38] sm:$0xff]  ;;  %v414_v18 = vld [vmem:[%s3032_s23 + $0x40] sm:$0xff]  ;;  %p2869_p12 = pnand %p2868_p11, %p3009_p5 }
  0x1e   : > { %v348_v15 = vld [vmem:[%s3037_s6 + $0x30] sm:$0xff]  ;;  %v349_v17 = vld [vmem:[%s3037_s6 + $0x38] sm:$0xff]  ;;  %v350_v19 = vld [vmem:[%s3037_s6 + $0x40] sm:$0xff] }
  0x1f   : > { %2637 = vmatmul.mubr.msk.f32.gmra.mxu0 %vm472_vm0, %v409_v8  ;;  %v415_v20 = vld [vmem:[%s3032_s23 + $0x48] sm:$0xff]  ;;  %v416_v22 = vld [vmem:[%s3032_s23 + $0x50] sm:$0xff]  ;;  %v417_v24 = vld [vmem:[%s3032_s23 + $0x58] sm:$0xff]  ;;  %p2870_p13 = pneg %p2869_p12 }
  0x20   : > { %2735 = vmatmul.mubr.msk.f32.gmra.mxu1 %vm472_vm0, %v345_v9  ;;  %2639 = vmatprep.mubr.msk.f32.mxu0 %vm472_vm0, %v410_v10  ;;  %v351_v21 = vld [vmem:[%s3037_s6 + $0x48] sm:$0xff]  ;;  %v352_v23 = vld [vmem:[%s3037_s6 + $0x50] sm:$0xff]  ;;  %v353_v25 = vld [vmem:[%s3037_s6 + $0x58] sm:$0xff] }
  0x21   : > { %2737 = vmatprep.mubr.msk.f32.mxu1 %vm472_vm0, %v346_v11  ;;  %v418_v26 = vld [vmem:[%s3032_s23 + $0x60] sm:$0xff]  ;;  %v419_v28 = vld [vmem:[%s3032_s23 + $0x68] sm:$0xff]  ;;  %v420_v30 = vld [vmem:[%s3032_s23 + $0x70] sm:$0xff] }
  0x22   : > { %v354_v27 = vld [vmem:[%s3037_s6 + $0x60] sm:$0xff]  ;;  %v355_v29 = vld [vmem:[%s3037_s6 + $0x68] sm:$0xff]  ;;  %v356_v31 = vld [vmem:[%s3037_s6 + $0x70] sm:$0xff] }
  0x23   : > { %2640 = vmatmul.mubr.msk.f32.gmra.mxu0 %vm472_vm0, %v411_v12  ;;  %v421_v32 = vld [vmem:[%s3032_s23 + $0x78] sm:$0xff]  ;;  %v422_v34 = vld [vmem:[%s3032_s23 + $0x80] sm:$0xff]  ;;  %v423_v36 = vld [vmem:[%s3032_s23 + $0x88] sm:$0xff] }
  0x24   : > { %2738 = vmatmul.mubr.msk.f32.gmra.mxu1 %vm472_vm0, %v347_v13  ;;  %2642 = vmatprep.mubr.msk.f32.mxu0 %vm472_vm0, %v412_v14  ;;  %v357_v33 = vld [vmem:[%s3037_s6 + $0x78] sm:$0xff]  ;;  %v358_v35 = vld [vmem:[%s3037_s6 + $0x80] sm:$0xff]  ;;  %v359_v37 = vld [vmem:[%s3037_s6 + $0x88] sm:$0xff] }
  0x25   : > { %2740 = vmatprep.mubr.msk.f32.mxu1 %vm472_vm0, %v348_v15  ;;  %v424_v38 = vld [vmem:[%s3032_s23 + $0x90] sm:$0xff]  ;;  %v425_v40 = vld [vmem:[%s3032_s23 + $0x98] sm:$0xff]  ;;  %v426_v42 = vld [vmem:[%s3032_s23 + $0xa0] sm:$0xff] }
  0x26   : > { %v360_v39 = vld [vmem:[%s3037_s6 + $0x90] sm:$0xff]  ;;  %v361_v41 = vld [vmem:[%s3037_s6 + $0x98] sm:$0xff]  ;;  %v362_v43 = vld [vmem:[%s3037_s6 + $0xa0] sm:$0xff] }
  0x27   : > { %2643 = vmatmul.mubr.msk.f32.gmra.mxu0 %vm472_vm0, %v413_v16  ;;  %v427_v44 = vld [vmem:[%s3032_s23 + $0xa8] sm:$0xff]  ;;  %v428_v46 = vld [vmem:[%s3032_s23 + $0xb0] sm:$0xff]  ;;  %v429_v48 = vld [vmem:[%s3032_s23 + $0xb8] sm:$0xff] }
  0x28   : > { %2741 = vmatmul.mubr.msk.f32.gmra.mxu1 %vm472_vm0, %v349_v17  ;;  %2645 = vmatprep.mubr.msk.f32.mxu0 %vm472_vm0, %v414_v18  ;;  %v363_v45 = vld [vmem:[%s3037_s6 + $0xa8] sm:$0xff]  ;;  %v364_v47 = vld [vmem:[%s3037_s6 + $0xb0] sm:$0xff]  ;;  %v365_v49 = vld [vmem:[%s3037_s6 + $0xb8] sm:$0xff] }
  0x29   : > { %2743 = vmatprep.mubr.msk.f32.mxu1 %vm472_vm0, %v350_v19  ;;  %v430_v50 = vld [vmem:[%s3032_s23 + $0xc0] sm:$0xff]  ;;  %v431_v52 = vld [vmem:[%s3032_s23 + $0xc8] sm:$0xff]  ;;  %v432_v54 = vld [vmem:[%s3032_s23 + $0xd0] sm:$0xff] }
  0x2a   : > { %v366_v51 = vld [vmem:[%s3037_s6 + $0xc0] sm:$0xff]  ;;  %v367_v53 = vld [vmem:[%s3037_s6 + $0xc8] sm:$0xff]  ;;  %v368_v55 = vld [vmem:[%s3037_s6 + $0xd0] sm:$0xff] }
  0x2b   : > { %2646 = vmatmul.mubr.msk.f32.gmra.mxu0 %vm472_vm0, %v415_v20  ;;  %v433_v56 = vld [vmem:[%s3032_s23 + $0xd8] sm:$0xff]  ;;  %v434_v58 = vld [vmem:[%s3032_s23 + $0xe0] sm:$0xff]  ;;  %v435_v60 = vld [vmem:[%s3032_s23 + $0xe8] sm:$0xff] }
  0x2c   : > { %2744 = vmatmul.mubr.msk.f32.gmra.mxu1 %vm472_vm0, %v351_v21  ;;  %2648 = vmatprep.mubr.msk.f32.mxu0 %vm472_vm0, %v416_v22  ;;  %v369_v57 = vld [vmem:[%s3037_s6 + $0xd8] sm:$0xff]  ;;  %v370_v59 = vld [vmem:[%s3037_s6 + $0xe0] sm:$0xff]  ;;  %v371_v61 = vld [vmem:[%s3037_s6 + $0xe8] sm:$0xff] }
  0x2d   : > { %2746 = vmatprep.mubr.msk.f32.mxu1 %vm472_vm0, %v352_v23  ;;  %v436_v62 = vld [vmem:[%s3032_s23 + $0xf0] sm:$0xff]  ;;  %v437_v0 = vld [vmem:[%s3032_s23 + $0xf8] sm:$0xff]  ;;  %v438_v2 = vld [vmem:[%s3032_s23 + $0x100] sm:$0xff] }
  0x2e   : > { %v372_v63 = vld [vmem:[%s3037_s6 + $0xf0] sm:$0xff]  ;;  %v373_v1 = vld [vmem:[%s3037_s6 + $0xf8] sm:$0xff]  ;;  %v374_v3 = vld [vmem:[%s3037_s6 + $0x100] sm:$0xff] }
  0x2f   : > { %2649 = vmatmul.mubr.msk.f32.gmra.mxu0 %vm472_vm0, %v417_v24  ;;  %v439_v4 = vld [vmem:[%s3032_s23 + $0x108] sm:$0xff]  ;;  %v440_v6 = vld [vmem:[%s3032_s23 + $0x110] sm:$0xff]  ;;  %v441_v8 = vld [vmem:[%s3032_s23 + $0x118] sm:$0xff] }
  0x30   : > { %2747 = vmatmul.mubr.msk.f32.gmra.mxu1 %vm472_vm0, %v353_v25  ;;  %2651 = vmatprep.mubr.msk.f32.mxu0 %vm472_vm0, %v418_v26  ;;  %v375_v5 = vld [vmem:[%s3037_s6 + $0x108] sm:$0xff]  ;;  %v376_v7 = vld [vmem:[%s3037_s6 + $0x110] sm:$0xff]  ;;  %v377_v9 = vld [vmem:[%s3037_s6 + $0x118] sm:$0xff] }
  0x31   : > { %2749 = vmatprep.mubr.msk.f32.mxu1 %vm472_vm0, %v354_v27  ;;  %v442_v10 = vld [vmem:[%s3032_s23 + $0x120] sm:$0xff]  ;;  %v443_v12 = vld [vmem:[%s3032_s23 + $0x128] sm:$0xff]  ;;  %v444_v14 = vld [vmem:[%s3032_s23 + $0x130] sm:$0xff] }
  0x32   : > { %v378_v11 = vld [vmem:[%s3037_s6 + $0x120] sm:$0xff]  ;;  %v379_v13 = vld [vmem:[%s3037_s6 + $0x128] sm:$0xff]  ;;  %v380_v15 = vld [vmem:[%s3037_s6 + $0x130] sm:$0xff] }
  0x33   : > { %2652 = vmatmul.mubr.msk.f32.gmra.mxu0 %vm472_vm0, %v419_v28  ;;  %v445_v16 = vld [vmem:[%s3032_s23 + $0x138] sm:$0xff]  ;;  %v446_v18 = vld [vmem:[%s3032_s23 + $0x140] sm:$0xff]  ;;  %v447_v20 = vld [vmem:[%s3032_s23 + $0x148] sm:$0xff] }
  0x34   : > { %2750 = vmatmul.mubr.msk.f32.gmra.mxu1 %vm472_vm0, %v355_v29  ;;  %2654 = vmatprep.mubr.msk.f32.mxu0 %vm472_vm0, %v420_v30  ;;  %v381_v17 = vld [vmem:[%s3037_s6 + $0x138] sm:$0xff]  ;;  %v382_v19 = vld [vmem:[%s3037_s6 + $0x140] sm:$0xff]  ;;  %v383_v21 = vld [vmem:[%s3037_s6 + $0x148] sm:$0xff] }
  0x35   : > { %2752 = vmatprep.mubr.msk.f32.mxu1 %vm472_vm0, %v356_v31  ;;  %v448_v22 = vld [vmem:[%s3032_s23 + $0x150] sm:$0xff]  ;;  %v449_v24 = vld [vmem:[%s3032_s23 + $0x158] sm:$0xff]  ;;  %v450_v26 = vld [vmem:[%s3032_s23 + $0x160] sm:$0xff] }
  0x36   : > { %v384_v23 = vld [vmem:[%s3037_s6 + $0x150] sm:$0xff]  ;;  %v385_v25 = vld [vmem:[%s3037_s6 + $0x158] sm:$0xff]  ;;  %v386_v27 = vld [vmem:[%s3037_s6 + $0x160] sm:$0xff] }
  0x37   : > { %2655 = vmatmul.mubr.msk.f32.gmra.mxu0 %vm472_vm0, %v421_v32  ;;  %v451_v28 = vld [vmem:[%s3032_s23 + $0x168] sm:$0xff]  ;;  %v452_v30 = vld [vmem:[%s3032_s23 + $0x170] sm:$0xff]  ;;  %v453_v32 = vld [vmem:[%s3032_s23 + $0x178] sm:$0xff] }
  0x38   : > { %2753 = vmatmul.mubr.msk.f32.gmra.mxu1 %vm472_vm0, %v357_v33  ;;  %2657 = vmatprep.mubr.msk.f32.mxu0 %vm472_vm0, %v422_v34  ;;  %v387_v29 = vld [vmem:[%s3037_s6 + $0x168] sm:$0xff]  ;;  %v388_v31 = vld [vmem:[%s3037_s6 + $0x170] sm:$0xff]  ;;  %v389_v33 = vld [vmem:[%s3037_s6 + $0x178] sm:$0xff] }
  0x39   : > { %2755 = vmatprep.mubr.msk.f32.mxu1 %vm472_vm0, %v358_v35  ;;  %v454_v34 = vld [vmem:[%s3032_s23 + $0x180] sm:$0xff] }
  0x3a   : > { %v390_v35 = vld [vmem:[%s3037_s6 + $0x180] sm:$0xff] }
  0x3b   : > { %2658 = vmatmul.mubr.msk.f32.gmra.mxu0 %vm472_vm0, %v423_v36  ;;  %v455_v36 = vld [vmem:[%s3032_s23 + $0x188] sm:$0xff] }
  0x3c   : > { %2756 = vmatmul.mubr.msk.f32.gmra.mxu1 %vm472_vm0, %v359_v37  ;;  %2660 = vmatprep.mubr.msk.f32.mxu0 %vm472_vm0, %v424_v38  ;;  %v391_v37 = vld [vmem:[%s3037_s6 + $0x188] sm:$0xff]  ;;  %v456_v38 = vld [vmem:[%s3032_s23 + $0x190] sm:$0xff] }
  0x3d   : > { %2758 = vmatprep.mubr.msk.f32.mxu1 %vm472_vm0, %v360_v39  ;;  %v392_v39 = vld [vmem:[%s3037_s6 + $0x190] sm:$0xff] }
  0x3f   : > { %2661 = vmatmul.mubr.msk.f32.gmra.mxu0 %vm472_vm0, %v425_v40  ;;  %v457_v40 = vld [vmem:[%s3032_s23 + $0x198] sm:$0xff] }
  0x40   : > { %2759 = vmatmul.mubr.msk.f32.gmra.mxu1 %vm472_vm0, %v361_v41  ;;  %2663 = vmatprep.mubr.msk.f32.mxu0 %vm472_vm0, %v426_v42  ;;  %v393_v41 = vld [vmem:[%s3037_s6 + $0x198] sm:$0xff]  ;;  %v458_v42 = vld [vmem:[%s3032_s23 + $0x1a0] sm:$0xff] }
  0x41   : > { %2761 = vmatprep.mubr.msk.f32.mxu1 %vm472_vm0, %v362_v43  ;;  %v394_v43 = vld [vmem:[%s3037_s6 + $0x1a0] sm:$0xff] }
  0x43   : > { %2664 = vmatmul.mubr.msk.f32.gmra.mxu0 %vm472_vm0, %v427_v44  ;;  %v459_v44 = vld [vmem:[%s3032_s23 + $0x1a8] sm:$0xff] }
  0x44   : > { %2762 = vmatmul.mubr.msk.f32.gmra.mxu1 %vm472_vm0, %v363_v45  ;;  %2666 = vmatprep.mubr.msk.f32.mxu0 %vm472_vm0, %v428_v46  ;;  %v395_v45 = vld [vmem:[%s3037_s6 + $0x1a8] sm:$0xff]  ;;  %v460_v46 = vld [vmem:[%s3032_s23 + $0x1b0] sm:$0xff] }
  0x45   : > { %2764 = vmatprep.mubr.msk.f32.mxu1 %vm472_vm0, %v364_v47  ;;  %v396_v47 = vld [vmem:[%s3037_s6 + $0x1b0] sm:$0xff] }
  0x47   : > { %2667 = vmatmul.mubr.msk.f32.gmra.mxu0 %vm472_vm0, %v429_v48  ;;  %v461_v48 = vld [vmem:[%s3032_s23 + $0x1b8] sm:$0xff] }
  0x48   : > { %2765 = vmatmul.mubr.msk.f32.gmra.mxu1 %vm472_vm0, %v365_v49  ;;  %2669 = vmatprep.mubr.msk.f32.mxu0 %vm472_vm0, %v430_v50  ;;  %v397_v49 = vld [vmem:[%s3037_s6 + $0x1b8] sm:$0xff]  ;;  %v462_v50 = vld [vmem:[%s3032_s23 + $0x1c0] sm:$0xff] }
  0x49   : > { %2767 = vmatprep.mubr.msk.f32.mxu1 %vm472_vm0, %v366_v51  ;;  %v398_v51 = vld [vmem:[%s3037_s6 + $0x1c0] sm:$0xff] }
  0x4b   : > { %2670 = vmatmul.mubr.msk.f32.gmra.mxu0 %vm472_vm0, %v431_v52  ;;  %v463_v52 = vld [vmem:[%s3032_s23 + $0x1c8] sm:$0xff] }
  0x4c   : > { %2768 = vmatmul.mubr.msk.f32.gmra.mxu1 %vm472_vm0, %v367_v53  ;;  %2672 = vmatprep.mubr.msk.f32.mxu0 %vm472_vm0, %v432_v54  ;;  %v399_v53 = vld [vmem:[%s3037_s6 + $0x1c8] sm:$0xff]  ;;  %v464_v54 = vld [vmem:[%s3032_s23 + $0x1d0] sm:$0xff] }
  0x4d   : > { %2770 = vmatprep.mubr.msk.f32.mxu1 %vm472_vm0, %v368_v55  ;;  %v400_v55 = vld [vmem:[%s3037_s6 + $0x1d0] sm:$0xff] }
  0x4f   : > { %2673 = vmatmul.mubr.msk.f32.gmra.mxu0 %vm472_vm0, %v433_v56  ;;  %v465_v56 = vld [vmem:[%s3032_s23 + $0x1d8] sm:$0xff] }
  0x50   : > { %2771 = vmatmul.mubr.msk.f32.gmra.mxu1 %vm472_vm0, %v369_v57  ;;  %2675 = vmatprep.mubr.msk.f32.mxu0 %vm472_vm0, %v434_v58  ;;  %v401_v57 = vld [vmem:[%s3037_s6 + $0x1d8] sm:$0xff]  ;;  %v466_v58 = vld [vmem:[%s3032_s23 + $0x1e0] sm:$0xff] }
  0x51   : > { %2773 = vmatprep.mubr.msk.f32.mxu1 %vm472_vm0, %v370_v59  ;;  %v402_v59 = vld [vmem:[%s3037_s6 + $0x1e0] sm:$0xff] }
  0x53   : > { %2676 = vmatmul.mubr.msk.f32.gmra.mxu0 %vm472_vm0, %v435_v60  ;;  %v467_v60 = vld [vmem:[%s3032_s23 + $0x1e8] sm:$0xff] }
  0x54   : > { %2774 = vmatmul.mubr.msk.f32.gmra.mxu1 %vm472_vm0, %v371_v61  ;;  %2678 = vmatprep.mubr.msk.f32.mxu0 %vm472_vm0, %v436_v62  ;;  %v403_v61 = vld [vmem:[%s3037_s6 + $0x1e8] sm:$0xff]  ;;  %v468_v62 = vld [vmem:[%s3032_s23 + $0x1f0] sm:$0xff] }
  0x55   : > { %2776 = vmatprep.mubr.msk.f32.mxu1 %vm472_vm0, %v372_v63  ;;  %v404_v63 = vld [vmem:[%s3037_s6 + $0x1f0] sm:$0xff] }
  0x57   : > { %2679 = vmatmul.mubr.msk.f32.gmra.mxu0 %vm472_vm0, %v437_v0  ;;  %v469_v0 = vld [vmem:[%s3032_s23 + $0x1f8] sm:$0xff]  ;;  %s2150_s23 = scalar_lea.hbm %s3692_s7, %s3025_s18 }
  0x58   : > { %2777 = vmatmul.mubr.msk.f32.gmra.mxu1 %vm472_vm0, %v373_v1  ;;  %2681 = vmatprep.mubr.msk.f32.mxu0 %vm472_vm0, %v438_v2  ;;  %v405_v1 = vld [vmem:[%s3037_s6 + $0x1f8] sm:$0xff]  ;;  %s2930_s6 = smov [#allocation3]  }
  0x59   : > { %2779 = vmatprep.mubr.msk.f32.mxu1 %vm472_vm0, %v374_v3  ;;  %s2871_s30 = sshll.u32 %s2930_s6, 4  ;;  %s2872_s30 = int_to_ptr.vmem [resolvable:$false] %s2871_s30 }
  0x5a   : > { %s2873_s9 = scalar_lea.vmem %s2872_s30, 128  ;;  %p2874_p0 = scmp.lt.s32.totalorder %s2153_s20, %s2872_s30 }
  0x5b   : > { %2682 = vmatmul.mubr.msk.f32.gmra.mxu0 %vm472_vm0, %v439_v4  ;;  %p2875_p1 = scmp.lt.s32.totalorder %s2873_s9, %s2867_s25 }
  0x5c   : > { %2780 = vmatmul.mubr.msk.f32.gmra.mxu1 %vm472_vm0, %v375_v5  ;;  %2684 = vmatprep.mubr.msk.f32.mxu0 %vm472_vm0, %v440_v6 }
  0x5d   : > { %2782 = vmatprep.mubr.msk.f32.mxu1 %vm472_vm0, %v376_v7  ;;  %p2876_p2 = por %p2875_p1, %p2874_p0 }
  0x5f   : > { %2685 = vmatmul.mubr.msk.f32.gmra.mxu0 %vm472_vm0, %v441_v8  ;;  %p2877_p3 = pnand %p2876_p2, %p2870_p13 }
  0x60   : > { %2783 = vmatmul.mubr.msk.f32.gmra.mxu1 %vm472_vm0, %v377_v9  ;;  %2687 = vmatprep.mubr.msk.f32.mxu0 %vm472_vm0, %v442_v10 }
  0x61   : > { %2785 = vmatprep.mubr.msk.f32.mxu1 %vm472_vm0, %v378_v11 }
  0x63   : > { %2688 = vmatmul.mubr.msk.f32.gmra.mxu0 %vm472_vm0, %v443_v12 }
  0x64   : > { %2786 = vmatmul.mubr.msk.f32.gmra.mxu1 %vm472_vm0, %v379_v13  ;;  %2690 = vmatprep.mubr.msk.f32.mxu0 %vm472_vm0, %v444_v14 }
  0x65   : > { %2788 = vmatprep.mubr.msk.f32.mxu1 %vm472_vm0, %v380_v15 }
  0x67   : > { %2691 = vmatmul.mubr.msk.f32.gmra.mxu0 %vm472_vm0, %v445_v16 }
  0x68   : > { %2789 = vmatmul.mubr.msk.f32.gmra.mxu1 %vm472_vm0, %v381_v17  ;;  %2693 = vmatprep.mubr.msk.f32.mxu0 %vm472_vm0, %v446_v18 }
  0x69   : > { %2791 = vmatprep.mubr.msk.f32.mxu1 %vm472_vm0, %v382_v19 }
  0x6b   : > { %2694 = vmatmul.mubr.msk.f32.gmra.mxu0 %vm472_vm0, %v447_v20 }
  0x6c   : > { %2792 = vmatmul.mubr.msk.f32.gmra.mxu1 %vm472_vm0, %v383_v21  ;;  %2696 = vmatprep.mubr.msk.f32.mxu0 %vm472_vm0, %v448_v22 }
  0x6d   : > { %2794 = vmatprep.mubr.msk.f32.mxu1 %vm472_vm0, %v384_v23 }
  0x6f   : > { %2697 = vmatmul.mubr.msk.f32.gmra.mxu0 %vm472_vm0, %v449_v24 }
  0x70   : > { %2795 = vmatmul.mubr.msk.f32.gmra.mxu1 %vm472_vm0, %v385_v25  ;;  %2699 = vmatprep.mubr.msk.f32.mxu0 %vm472_vm0, %v450_v26 }
  0x71   : > { %2797 = vmatprep.mubr.msk.f32.mxu1 %vm472_vm0, %v386_v27 }
  0x73   : > { %2700 = vmatmul.mubr.msk.f32.gmra.mxu0 %vm472_vm0, %v451_v28 }
  0x74   : > { %2798 = vmatmul.mubr.msk.f32.gmra.mxu1 %vm472_vm0, %v387_v29  ;;  %2702 = vmatprep.mubr.msk.f32.mxu0 %vm472_vm0, %v452_v30 }
  0x75   : > { %2800 = vmatprep.mubr.msk.f32.mxu1 %vm472_vm0, %v388_v31 }
  0x77   : > { %2703 = vmatmul.mubr.msk.f32.gmra.mxu0 %vm472_vm0, %v453_v32 }
  0x78   : > { %2801 = vmatmul.mubr.msk.f32.gmra.mxu1 %vm472_vm0, %v389_v33  ;;  %2705 = vmatprep.mubr.msk.f32.mxu0 %vm472_vm0, %v454_v34 }
  0x79   : > { %2803 = vmatprep.mubr.msk.f32.mxu1 %vm472_vm0, %v390_v35 }
  0x7b   : > { %2706 = vmatmul.mubr.msk.f32.gmra.mxu0 %vm472_vm0, %v455_v36 }
  0x7c   : > { %2804 = vmatmul.mubr.msk.f32.gmra.mxu1 %vm472_vm0, %v391_v37  ;;  %2708 = vmatprep.mubr.msk.f32.mxu0 %vm472_vm0, %v456_v38 }
  0x7d   : > { %2806 = vmatprep.mubr.msk.f32.mxu1 %vm472_vm0, %v392_v39 }
  0x7f   : > { %2709 = vmatmul.mubr.msk.f32.gmra.mxu0 %vm472_vm0, %v457_v40 }
  0x80   : > { %2807 = vmatmul.mubr.msk.f32.gmra.mxu1 %vm472_vm0, %v393_v41  ;;  %2711 = vmatprep.mubr.msk.f32.mxu0 %vm472_vm0, %v458_v42 }
  0x81   : > { %2809 = vmatprep.mubr.msk.f32.mxu1 %vm472_vm0, %v394_v43 }
  0x83   : > { %2712 = vmatmul.mubr.msk.f32.gmra.mxu0 %vm472_vm0, %v459_v44 }
  0x84   : > { %2810 = vmatmul.mubr.msk.f32.gmra.mxu1 %vm472_vm0, %v395_v45  ;;  %2714 = vmatprep.mubr.msk.f32.mxu0 %vm472_vm0, %v460_v46 }
  0x85   : > { %2812 = vmatprep.mubr.msk.f32.mxu1 %vm472_vm0, %v396_v47 }
  0x87   : > { %2715 = vmatmul.mubr.msk.f32.gmra.mxu0 %vm472_vm0, %v461_v48 }
  0x88   : > { %2813 = vmatmul.mubr.msk.f32.gmra.mxu1 %vm472_vm0, %v397_v49  ;;  %2717 = vmatprep.mubr.msk.f32.mxu0 %vm472_vm0, %v462_v50 }
  0x89   : > { %2815 = vmatprep.mubr.msk.f32.mxu1 %vm472_vm0, %v398_v51 }
  0x8b   : > { %2718 = vmatmul.mubr.msk.f32.gmra.mxu0 %vm472_vm0, %v463_v52 }
  0x8c   : > { %2816 = vmatmul.mubr.msk.f32.gmra.mxu1 %vm472_vm0, %v399_v53  ;;  %2720 = vmatprep.mubr.msk.f32.mxu0 %vm472_vm0, %v464_v54 }
  0x8d   : > { %2818 = vmatprep.mubr.msk.f32.mxu1 %vm472_vm0, %v400_v55 }
  0x8f   : > { %2721 = vmatmul.mubr.msk.f32.gmra.mxu0 %vm472_vm0, %v465_v56 }
  0x90   : > { %2819 = vmatmul.mubr.msk.f32.gmra.mxu1 %vm472_vm0, %v401_v57  ;;  %2723 = vmatprep.mubr.msk.f32.mxu0 %vm472_vm0, %v466_v58 }
  0x91   : > { %2821 = vmatprep.mubr.msk.f32.mxu1 %vm472_vm0, %v402_v59 }
  0x93   : > { %2724 = vmatmul.mubr.msk.f32.gmra.mxu0 %vm472_vm0, %v467_v60 }
  0x94   : > { %2822 = vmatmul.mubr.msk.f32.gmra.mxu1 %vm472_vm0, %v403_v61  ;;  %2726 = vmatprep.mubr.msk.f32.mxu0 %vm472_vm0, %v468_v62 }
  0x95   : > { %2824 = vmatprep.mubr.msk.f32.mxu1 %vm472_vm0, %v404_v63 }
  0x97   : > { %2727 = vmatmul.mubr.msk.f32.gmra.mxu0 %vm472_vm0, %v469_v0 }
  0x98   : > { %2825 = vmatmul.mubr.msk.f32.gmra.mxu1 %vm472_vm0, %v405_v1 }
  0xdb   : > { %v2635_v2 = vpop.f32.mrf.mxu0 }
  0xdc   : > { %v2733_v3 = vpop.f32.mrf.mxu1 }
  0xdd   : > { %v3295_v4 = vadd.f32 %v2733_v3, %v2635_v2  ;;  %v731_v5 = vpop.f32.mrf.mxu0 }
  0xde   : > { %v1308_v6 = vpop.f32.mrf.mxu1 }
  0xdf   : > { %v3297_v7 = vadd.f32 %v1308_v6, %v731_v5  ;;  %v2638_v8 = vpop.f32.mrf.mxu0 }
  0xe0   : > { %v2736_v9 = vpop.f32.mrf.mxu1 }
  0xe1   : > { %v3299_v10 = vadd.f32 %v2736_v9, %v2638_v8  ;;  %v741_v11 = vpop.f32.mrf.mxu0 }
  0xe2   : > { %v1318_v12 = vpop.f32.mrf.mxu1 }
  0xe3   : > { %v3301_v13 = vadd.f32 %v1318_v12, %v741_v11  ;;  %v2641_v14 = vpop.f32.mrf.mxu0 }
  0xe4   : > { %v2739_v15 = vpop.f32.mrf.mxu1 }
  0xe5   : > { %v3303_v16 = vadd.f32 %v2739_v15, %v2641_v14  ;;  %v751_v17 = vpop.f32.mrf.mxu0 }
  0xe6   : > { %v1328_v18 = vpop.f32.mrf.mxu1 }
  0xe7   : > { %v3305_v19 = vadd.f32 %v1328_v18, %v751_v17  ;;  %v2644_v20 = vpop.f32.mrf.mxu0 }
  0xe8   : > { %v2742_v21 = vpop.f32.mrf.mxu1 }
  0xe9   : > { %v3307_v22 = vadd.f32 %v2742_v21, %v2644_v20  ;;  %v761_v23 = vpop.f32.mrf.mxu0  ;;  %v3362_v21 = vld [vmem:[%s3689_s4] ss:$0 sm:$0xff] }
  0xea   : > { %v1338_v24 = vpop.f32.mrf.mxu1 }
  0xeb   : > { %v3309_v25 = vadd.f32 %v1338_v24, %v761_v23  ;;  %v2647_v26 = vpop.f32.mrf.mxu0 }
  0xec   : > { %v2745_v27 = vpop.f32.mrf.mxu1 }
  0xed   : > { %v3311_v28 = vadd.f32 %v2745_v27, %v2647_v26  ;;  %v771_v29 = vpop.f32.mrf.mxu0 }
  0xee   : > { %v1348_v30 = vpop.f32.mrf.mxu1 }
  0xef   : > { %v3313_v31 = vadd.f32 %v1348_v30, %v771_v29  ;;  %v3315_v32 = vpop.f32.mrf.mxu0 }
  0xf0   : > { %v3317_v33 = vpop.f32.mrf.mxu1 }
  0xf1   : > { %v3319_v34 = vpop.f32.mrf.mxu0 }
  0xf2   : > { %v3321_v35 = vpop.f32.mrf.mxu1 }
  0xf3   : > { %v2653_v36 = vpop.f32.mrf.mxu0 }
  0xf4   : > { %v2751_v37 = vpop.f32.mrf.mxu1 }
  0xf5   : > { %v3323_v38 = vpop.f32.mrf.mxu0 }
  0xf6   : > { %v3325_v39 = vpop.f32.mrf.mxu1 }
  0xf7   : > { %v2656_v40 = vpop.f32.mrf.mxu0 }
  0xf8   : > { %v2754_v41 = vpop.f32.mrf.mxu1 }
  0xf9   : > { %v801_v42 = vpop.f32.mrf.mxu0  ;;  %v1384_v14 = vadd.f32 %v2754_v41, %v2656_v40  ;;  %v3369_v40 = vld [vmem:[%s3690_s5] sm:$0x1] }
  0xfa   : > { %v1378_v43 = vpop.f32.mrf.mxu1  ;;  %2595 = vmatprep.mubr.msk.f32.mxu0 %vm1765_vm1, %v3369_v40  ;;  %2629 = vmatprep.mubr.msk.f32.mxu1 %vm1765_vm1, %v3369_v40 }
  0xfb   : > { %v2659_v44 = vpop.f32.mrf.mxu0  ;;  %v1649_v24 = vadd.f32 %v3362_v21, %v1384_v14  ;;  %v1379_v26 = vadd.f32 %v1378_v43, %v801_v42 }
  0xfc   : > { %v2757_v45 = vpop.f32.mrf.mxu1 }
  0xfd   : > { %v3327_v46 = vadd.f32 %v2757_v45, %v2659_v44  ;;  %v811_v47 = vpop.f32.mrf.mxu0 }
  0xfe   : > { %v1388_v48 = vpop.f32.mrf.mxu1 }
  0xff   : > { %v3329_v49 = vadd.f32 %v1388_v48, %v811_v47  ;;  %v2662_v50 = vpop.f32.mrf.mxu0 }
 0x100   : > { %v2760_v51 = vpop.f32.mrf.mxu1 }
 0x101   : > { %v3331_v52 = vadd.f32 %v2760_v51, %v2662_v50  ;;  %v821_v53 = vpop.f32.mrf.mxu0  ;;  %v1374_v50 = vadd.f32 %v2751_v37, %v2653_v36  ;;  %v1713_v51 = vmax.f32 %v1649_v24, 0.0  ;;  %v1369_v37 = vadd.f32 %v3325_v39, %v3323_v38 }
 0x102   : > { %v1398_v54 = vpop.f32.mrf.mxu1  ;;  %v1364_v38 = vadd.f32 %v3317_v33, %v3315_v32  ;;  %v1359_v33 = vadd.f32 %v3321_v35, %v3319_v34 }
 0x103   : > { %v3333_v55 = vadd.f32 %v1398_v54, %v821_v53  ;;  %v3335_v56 = vpop.f32.mrf.mxu0  ;;  %v1648_v53 = vadd.f32 %v3362_v21, %v1379_v26  ;;  %v1647_v36 = vadd.f32 %v3362_v21, %v1374_v50 }
 0x104   : > { %v3337_v57 = vpop.f32.mrf.mxu1  ;;  %v1645_v32 = vadd.f32 %v3362_v21, %v1364_v38  ;;  %v1644_v35 = vadd.f32 %v3362_v21, %v1359_v33 }
 0x105   : > { %v3339_v58 = vpop.f32.mrf.mxu0  ;;  %v1712_v24 = vmax.f32 %v1648_v53, 0.0  ;;  %v1711_v39 = vmax.f32 %v1647_v36, 0.0 }
 0x106   : > { %v3341_v59 = vpop.f32.mrf.mxu1  ;;  %v1709_v34 = vmax.f32 %v1645_v32, 0.0 }
 0x107   : > { %v3343_v60 = vpop.f32.mrf.mxu0 }
 0x108   : > { %v3345_v61 = vpop.f32.mrf.mxu1 }
 0x109   : > { %v3347_v62 = vpop.f32.mrf.mxu0 }
 0x10a   : > { %v3349_v63 = vpop.f32.mrf.mxu1 }
 0x10b   : > { %v3351_v0 = vpop.f32.mrf.mxu0 }
 0x10c   : > { %v3353_v1 = vpop.f32.mrf.mxu1 }
 0x10d   : > { %v3355_v2 = vpop.f32.mrf.mxu0 }
 0x10e   : > { %v3357_v3 = vpop.f32.mrf.mxu1 }
 0x10f   : > { %v2674_v5 = vpop.f32.mrf.mxu0 }
 0x110   : > { %v2772_v6 = vpop.f32.mrf.mxu1 }
 0x111   : > { %v861_v8 = vpop.f32.mrf.mxu0  ;;  %v1444_v26 = vadd.f32 %v2772_v6, %v2674_v5 }
 0x112   : > { %v1438_v9 = vpop.f32.mrf.mxu1 }
 0x113   : > { %v2677_v11 = vpop.f32.mrf.mxu0  ;;  %v1661_v50 = vadd.f32 %v3362_v21, %v1444_v26 }
 0x114   : > { %v2775_v12 = vpop.f32.mrf.mxu1 }
 0x115   : > { %v871_v15 = vpop.f32.mrf.mxu0  ;;  %v1454_v30 = vadd.f32 %v2775_v12, %v2677_v11 }
 0x116   : > { %v1448_v17 = vpop.f32.mrf.mxu1 }
 0x117   : > { %v2680_v18 = vpop.f32.mrf.mxu0  ;;  %v1663_v12 = vadd.f32 %v3362_v21, %v1454_v30  ;;  %v1449_v14 = vadd.f32 %v1448_v17, %v871_v15 }
 0x118   : > { %v2778_v20 = vpop.f32.mrf.mxu1 }
 0x119   : > { %v1464_v23 = vadd.f32 %v2778_v20, %v2680_v18  ;;  %v881_v27 = vpop.f32.mrf.mxu0  ;;  %v1727_v30 = vmax.f32 %v1663_v12, 0.0 }
 0x11a   : > { %v1458_v29 = vpop.f32.mrf.mxu1 }
 0x11b   : > { %v1665_v44 = vadd.f32 %v3362_v21, %v1464_v23  ;;  %v1459_v45 = vadd.f32 %v1458_v29, %v881_v27  ;;  %v2683_v41 = vpop.f32.mrf.mxu0 }
 0x11c   : > { %v2781_v47 = vpop.f32.mrf.mxu1 }
 0x11d   : > { %v1729_v42 = vmax.f32 %v1665_v44, 0.0  ;;  %v1664_v43 = vadd.f32 %v3362_v21, %v1459_v45  ;;  %v3376_v48 = vadd.f32 %v2781_v47, %v2683_v41  ;;  %v891_v54 = vpop.f32.mrf.mxu0  ;;  %v1662_v44 = vadd.f32 %v3362_v21, %v1449_v14 }
 0x11e   : > { %v1468_v11 = vpop.f32.mrf.mxu1 }
 0x11f   : > { %v1728_v18 = vmax.f32 %v1664_v43, 0.0  ;;  %v3380_v20 = vadd.f32 %v1468_v11, %v891_v54  ;;  %2563 = vmatprep.subr.msk.mxu0 %vm1765_vm1, %v1729_v42  ;;  %v2686_v23 = vpop.f32.mrf.mxu0  ;;  %v1646_v43 = vadd.f32 %v3362_v21, %v1369_v37  ;;  %v1726_v53 = vmax.f32 %v1662_v44, 0.0 }
 0x120   : > { %v2784_v27 = vpop.f32.mrf.mxu1  ;;  %2564 = vmatpush3.xpose.msk.msra.mxu0 %vm1765_vm1, %v1713_v51  ;;  %v1439_v51 = vadd.f32 %v1438_v9, %v861_v8  ;;  %v1434_v8 = vadd.f32 %v3353_v1, %v3351_v0  ;;  %v1725_v9 = vmax.f32 %v1661_v50, 0.0  ;;  %v1429_v1 = vadd.f32 %v3357_v3, %v3355_v2 }
 0x121   : > { %v3384_v29 = vadd.f32 %v2784_v27, %v2686_v23  ;;  %2565 = vmatprep.subr.msk.mxu0 %vm1765_vm1, %v1728_v18  ;;  %v901_v15 = vpop.f32.mrf.mxu0  ;;  %v1710_v18 = vmax.f32 %v1646_v43, 0.0  ;;  %v1708_v43 = vmax.f32 %v1644_v35, 0.0  ;;  %v1424_v2 = vadd.f32 %v3345_v61, %v3343_v60 }
 0x122   : > { %v1478_v17 = vpop.f32.mrf.mxu1  ;;  %v1660_v36 = vadd.f32 %v3362_v21, %v1439_v51  ;;  %v1659_v0 = vadd.f32 %v3362_v21, %v1434_v8  ;;  %v1658_v50 = vadd.f32 %v3362_v21, %v1429_v1  ;;  %v1419_v61 = vadd.f32 %v3349_v63, %v3347_v62 }
 0x123   : > { %v3391_v45 = vadd.f32 %v1478_v17, %v901_v15  ;;  %v2689_v41 = vpop.f32.mrf.mxu0  ;;  %v1657_v60 = vadd.f32 %v3362_v21, %v1424_v2  ;;  %v1414_v62 = vadd.f32 %v3337_v57, %v3335_v56  ;;  %v1640_v35 = vadd.f32 %v3362_v21, %v3309_v25 }
 0x124   : > { %v2787_v47 = vpop.f32.mrf.mxu1  ;;  %2566 = vmatpush3.xpose.msk.msra.mxu0 %vm1765_vm1, %v1712_v24  ;;  %v1724_v44 = vmax.f32 %v1660_v36, 0.0  ;;  %v1723_v3 = vmax.f32 %v1659_v0, 0.0  ;;  %v1722_v33 = vmax.f32 %v1658_v50, 0.0  ;;  %v1656_v36 = vadd.f32 %v3362_v21, %v1419_v61 }
 0x125   : > { %v3394_v42 = vadd.f32 %v2787_v47, %v2689_v41  ;;  %2567 = vmatprep.subr.msk.mxu0 %vm1765_vm1, %v1727_v30  ;;  %v911_v5 = vpop.f32.mrf.mxu0  ;;  %v1721_v63 = vmax.f32 %v1657_v60, 0.0  ;;  %v1655_v0 = vadd.f32 %v3362_v21, %v1414_v62  ;;  %v1409_v56 = vadd.f32 %v3341_v59, %v3339_v58 }
 0x126   : > { %v1488_v6 = vpop.f32.mrf.mxu1  ;;  %v1720_v57 = vmax.f32 %v1656_v36, 0.0  ;;  %v1639_v25 = vadd.f32 %v3362_v21, %v3303_v16  ;;  %v1704_v2 = vmax.f32 %v1640_v35, 0.0  ;;  %v1638_v16 = vadd.f32 %v3362_v21, %v3305_v19 }
 0x127   : > { %v3401_v54 = vadd.f32 %v1488_v6, %v911_v5  ;;  %v2692_v11 = vpop.f32.mrf.mxu0  ;;  %v1654_v58 = vadd.f32 %v3362_v21, %v1409_v56 }
 0x128   : > { %v2790_v12 = vpop.f32.mrf.mxu1  ;;  %2568 = vmatpush3.xpose.msk.msra.mxu0 %vm1765_vm1, %v1711_v39  ;;  %v1643_v39 = vadd.f32 %v3362_v21, %v3311_v28  ;;  %v1703_v61 = vmax.f32 %v1639_v25, 0.0  ;;  %v1702_v19 = vmax.f32 %v1638_v16, 0.0 }
 0x129   : > { %v3404_v14 = vadd.f32 %v2790_v12, %v2692_v11  ;;  %2569 = vmatprep.subr.msk.mxu0 %vm1765_vm1, %v1726_v53  ;;  %v921_v23 = vpop.f32.mrf.mxu0  ;;  %v1642_v11 = vadd.f32 %v3362_v21, %v3313_v31  ;;  %v1641_v31 = vadd.f32 %v3362_v21, %v3307_v22  ;;  %v1718_v62 = vmax.f32 %v1654_v58, 0.0 }
 0x12a   : > { %v1498_v27 = vpop.f32.mrf.mxu1  ;;  %v1707_v28 = vmax.f32 %v1643_v39, 0.0  ;;  %v1650_v58 = vadd.f32 %v3362_v21, %v3329_v49 }
 0x12b   : > { %v3413_v37 = vadd.f32 %v1498_v27, %v921_v23  ;;  %v2695_v24 = vpop.f32.mrf.mxu0  ;;  %v1706_v27 = vmax.f32 %v1642_v11, 0.0  ;;  %v1705_v22 = vmax.f32 %v1641_v31, 0.0 }
 0x12c   : > { %v2793_v15 = vpop.f32.mrf.mxu1  ;;  %2570 = vmatpush3.xpose.msk.msra.mxu0 %vm1765_vm1, %v1710_v18 }
 0x12d   : > { %v3416_v17 = vadd.f32 %v2793_v15, %v2695_v24  ;;  %2571 = vmatprep.subr.msk.mxu0 %vm1765_vm1, %v1725_v9  ;;  %v931_v26 = vpop.f32.mrf.mxu0 }
 0x12e   : > { %v1508_v30 = vpop.f32.mrf.mxu1 }
 0x12f   : > { %v3423_v41 = vadd.f32 %v1508_v30, %v931_v26  ;;  %v3425_v47 = vpop.f32.mrf.mxu0 }
 0x130   : > { %v3427_v38 = vpop.f32.mrf.mxu1  ;;  %2572 = vmatpush3.xpose.msk.msra.mxu0 %vm1765_vm1, %v1709_v34 }
 0x131   : > { %2573 = vmatprep.subr.msk.mxu0 %vm1765_vm1, %v1724_v44  ;;  %v3433_v5 = vpop.f32.mrf.mxu0 }
 0x132   : > { %v3435_v6 = vpop.f32.mrf.mxu1 }
 0x133   : > { %v3440_v51 = vpop.f32.mrf.mxu0 }
 0x134   : > { %v3442_v53 = vpop.f32.mrf.mxu1  ;;  %2574 = vmatpush3.xpose.msk.msra.mxu0 %vm1765_vm1, %v1708_v43 }
 0x135   : > { %2575 = vmatprep.subr.msk.mxu0 %vm1765_vm1, %v1723_v3  ;;  %v3448_v12 = vpop.f32.mrf.mxu0 }
 0x136   : > { %v3450_v32 = vpop.f32.mrf.mxu1 }
 0x137   : > { %v3455_v18 = vpop.f32.mrf.mxu0 }
 0x138   : > { %v3457_v23 = vpop.f32.mrf.mxu1  ;;  %2576 = vmatpush3.xpose.msk.msra.mxu0 %vm1765_vm1, %v1707_v28  ;;  %v1719_v28 = vmax.f32 %v1655_v0, 0.0 }
 0x139   : > { %2577 = vmatprep.subr.msk.mxu0 %vm1765_vm1, %v1722_v33  ;;  %v3463_v8 = vpop.f32.mrf.mxu0 }
 0x13a   : > { %v3465_v9 = vpop.f32.mrf.mxu1 }
 0x13b   : > { %v2707_v24 = vpop.f32.mrf.mxu0 }
 0x13c   : > { %v2805_v15 = vpop.f32.mrf.mxu1  ;;  %2578 = vmatpush3.xpose.msk.msra.mxu0 %vm1765_vm1, %v1706_v27  ;;  %v1653_v27 = vadd.f32 %v3362_v21, %v3331_v52  ;;  %v1652_v52 = vadd.f32 %v3362_v21, %v3333_v55 }
 0x13d   : > { %v3471_v34 = vadd.f32 %v2805_v15, %v2707_v24  ;;  %2579 = vmatprep.subr.msk.mxu0 %vm1765_vm1, %v1721_v63  ;;  %v971_v26 = vpop.f32.mrf.mxu0  ;;  %v1637_v24 = vadd.f32 %v3362_v21, %v3299_v10  ;;  %v1636_v10 = vadd.f32 %v3362_v21, %v3301_v13 }
 0x13e   : > { %v1548_v30 = vpop.f32.mrf.mxu1  ;;  %v1717_v35 = vmax.f32 %v1653_v27, 0.0  ;;  %v1716_v55 = vmax.f32 %v1652_v52, 0.0  ;;  %v1634_v27 = vadd.f32 %v3362_v21, %v3297_v7 }
 0x13f   : > { %v3479_v1 = vadd.f32 %v1548_v30, %v971_v26  ;;  %v2710_v44 = vpop.f32.mrf.mxu0  ;;  %v1701_v0 = vmax.f32 %v1637_v24, 0.0 }
 0x140   : > { %v2808_v39 = vpop.f32.mrf.mxu1  ;;  %2580 = vmatpush3.xpose.msk.msra.mxu0 %vm1765_vm1, %v1705_v22 }
 0x141   : > { %v3482_v43 = vadd.f32 %v2808_v39, %v2710_v44  ;;  %2581 = vmatprep.subr.msk.mxu0 %vm1765_vm1, %v1720_v57  ;;  %v981_v3 = vpop.f32.mrf.mxu0  ;;  %v1651_v44 = vadd.f32 %v3362_v21, %v3327_v46 }
 0x142   : > { %v1558_v50 = vpop.f32.mrf.mxu1 }
 0x143   : > { %v3488_v59 = vadd.f32 %v1558_v50, %v981_v3  ;;  %v3490_v11 = vpop.f32.mrf.mxu0  ;;  %v1700_v3 = vmax.f32 %v1636_v10, 0.0 }
 0x144   : > { %v3492_v60 = vpop.f32.mrf.mxu1  ;;  %2582 = vmatpush3.xpose.msk.msra.mxu0 %vm1765_vm1, %v1704_v2  ;;  %v1635_v2 = vadd.f32 %v3362_v21, %v3295_v4  ;;  %v1544_v4 = vadd.f32 %v3457_v23, %v3455_v18 }
 0x145   : > { %2583 = vmatprep.subr.msk.mxu0 %vm1765_vm1, %v1719_v28  ;;  %v3498_v33 = vpop.f32.mrf.mxu0  ;;  %v1715_v28 = vmax.f32 %v1651_v44, 0.0  ;;  %v1539_v44 = vadd.f32 %v3465_v9, %v3463_v8 }
 0x146   : > { %v3500_v31 = vpop.f32.mrf.mxu1  ;;  %v1699_v46 = vmax.f32 %v1635_v2, 0.0  ;;  %v1681_v10 = vadd.f32 %v3362_v21, %v1544_v4 }
 0x147   : > { %v3504_v63 = vpop.f32.mrf.mxu0 }
 0x148   : > { %v3506_v36 = vpop.f32.mrf.mxu1  ;;  %2584 = vmatpush3.xpose.msk.msra.mxu0 %vm1765_vm1, %v1703_v61 }
 0x149   : > { %2585 = vmatprep.subr.msk.mxu0 %vm1765_vm1, %v1718_v62  ;;  %v3512_v15 = vpop.f32.mrf.mxu0 }
 0x14a   : > { %v3514_v22 = vpop.f32.mrf.mxu1 }
 0x14b   : > { %v3518_v26 = vpop.f32.mrf.mxu0 }
 0x14c   : > { %v3520_v30 = vpop.f32.mrf.mxu1  ;;  %2586 = vmatpush3.xpose.msk.msra.mxu0 %vm1765_vm1, %v1702_v19  ;;  %v1714_v19 = vmax.f32 %v1650_v58, 0.0  ;;  %v1534_v58 = vadd.f32 %v3442_v53, %v3440_v51  ;;  %v1529_v51 = vadd.f32 %v3450_v32, %v3448_v12  ;;  %v1519_v32 = vadd.f32 %v3435_v6, %v3433_v5 }
 0x14d   : > { %2587 = vmatprep.subr.msk.mxu0 %vm1765_vm1, %v1717_v35  ;;  %v3526_v56 = vpop.f32.mrf.mxu0  ;;  %v1675_v6 = vadd.f32 %v3362_v21, %v3416_v17  ;;  %v1579_v17 = vadd.f32 %v3514_v22, %v3512_v15  ;;  %v1672_v22 = vadd.f32 %v3362_v21, %v3413_v37 }
 0x14e   : > { %v3528_v57 = vpop.f32.mrf.mxu1 }
 0x14f   : > { %v2722_v39 = vpop.f32.mrf.mxu0 }
 0x150   : > { %v2820_v25 = vpop.f32.mrf.mxu1  ;;  %2588 = vmatpush3.xpose.msk.msra.mxu0 %vm1765_vm1, %v1701_v0  ;;  %v1698_v0 = vmax.f32 %v1634_v27, 0.0  ;;  %v1680_v27 = vadd.f32 %v3362_v21, %v1539_v44 }
 0x151   : > { %2589 = vmatprep.subr.msk.mxu0 %vm1765_vm1, %v1716_v55  ;;  %v1021_v50 = vpop.f32.mrf.mxu0 }
 0x152   : > { %v1598_v13 = vpop.f32.mrf.mxu1  ;;  %v1744_v53 = vmax.f32 %v1680_v27, 0.0 }
 0x153   : > { %v2725_v61 = vpop.f32.mrf.mxu0 }
 0x154   : > { %v2823_v16 = vpop.f32.mrf.mxu1  ;;  %2590 = vmatpush3.xpose.msk.msra.mxu0 %vm1765_vm1, %v1700_v3 }
 0x155   : > { %2591 = vmatprep.subr.msk.mxu0 %vm1765_vm1, %v1715_v28  ;;  %v1031_v62 = vpop.f32.mrf.mxu0  ;;  %v1614_v2 = vadd.f32 %v2823_v16, %v2725_v61  ;;  %v1679_v61 = vadd.f32 %v3362_v21, %v1534_v58  ;;  %v1604_v16 = vadd.f32 %v2820_v25, %v2722_v39 }
 0x156   : > { %v1608_v24 = vpop.f32.mrf.mxu1 }
 0x157   : > { %v2728_v35 = vpop.f32.mrf.mxu0  ;;  %v1695_v4 = vadd.f32 %v3362_v21, %v1614_v2  ;;  %v1609_v8 = vadd.f32 %v1608_v24, %v1031_v62  ;;  %v1524_v24 = vadd.f32 %v3427_v38, %v3425_v47  ;;  %v1594_v47 = vadd.f32 %v3520_v30, %v3518_v26 }
 0x158   : > { %v2826_v52 = vpop.f32.mrf.mxu1  ;;  %2592 = vmatpush3.xpose.msk.msra.mxu0 %vm1765_vm1, %v1699_v46  ;;  %v1745_v46 = vmax.f32 %v1681_v10, 0.0  ;;  %v1584_v30 = vadd.f32 %v3506_v36, %v3504_v63  ;;  %v1673_v63 = vadd.f32 %v3362_v21, %v3404_v14  ;;  %v1569_v14 = vadd.f32 %v3500_v31, %v3498_v33 }
 0x159   : > { %v1624_v49 = vadd.f32 %v2826_v52, %v2728_v35  ;;  %2593 = vmatprep.subr.msk.mxu0 %vm1765_vm1, %v1714_v19  ;;  %v1041_v7 = vpop.f32.mrf.mxu0  ;;  %v1759_v19 = vmax.f32 %v1695_v4, 0.0  ;;  %v1694_v62 = vadd.f32 %v3362_v21, %v1609_v8  ;;  %v1743_v35 = vmax.f32 %v1679_v61, 0.0 }
 0x15a   : > { %v1618_v55 = vpop.f32.mrf.mxu1  ;;  %v1678_v52 = vadd.f32 %v3362_v21, %v1529_v51  ;;  %v1677_v12 = vadd.f32 %v3362_v21, %v1524_v24  ;;  %v1691_v44 = vadd.f32 %v3362_v21, %v1594_v47  ;;  %v1737_v15 = vmax.f32 %v1673_v63, 0.0 }
 0x15b   : > { %v1697_v18 = vadd.f32 %v3362_v21, %v1624_v49  ;;  %v1619_v23 = vadd.f32 %v1618_v55, %v1041_v7  ;;  %v1693_v49 = vadd.f32 %v3362_v21, %v1604_v16  ;;  %v1758_v10 = vmax.f32 %v1694_v62, 0.0 }
 0x15c   : > { %2594 = vmatpush3.xpose.msk.msra.mxu0 %vm1765_vm1, %v1698_v0  ;;  %v1599_v0 = vadd.f32 %v1598_v13, %v1021_v50  ;;  %v1742_v39 = vmax.f32 %v1678_v52, 0.0  ;;  %v1741_v50 = vmax.f32 %v1677_v12, 0.0  ;;  %v1676_v13 = vadd.f32 %v3362_v21, %v1519_v32 }
 0x15d   : > { %v1761_v3 = vmax.f32 %v1697_v18, 0.0  ;;  %v1696_v28 = vadd.f32 %v3362_v21, %v1619_v23  ;;  %v1757_v38 = vmax.f32 %v1693_v49, 0.0  ;;  %v1589_v7 = vadd.f32 %v3528_v57, %v3526_v56 }
 0x15e   : > { %v1692_v25 = vadd.f32 %v3362_v21, %v1599_v0  ;;  %v1740_v26 = vmax.f32 %v1676_v13, 0.0  ;;  %v1755_v55 = vmax.f32 %v1691_v44, 0.0  ;;  %v1739_v56 = vmax.f32 %v1675_v6, 0.0 }
 0x15f   : > { %v1760_v9 = vmax.f32 %v1696_v28, 0.0  ;;  %2597 = vmatprep.subr.msk.mxu1 %vm1765_vm1, %v1761_v3  ;;  %2596 = vmatmul.mubr.msk.f32.vlgmr.msra.gmra.mxu0 %vm1765_vm1, %v3369_v40  ;;  %v1690_v2 = vadd.f32 %v3362_v21, %v1589_v7  ;;  %v1674_v57 = vadd.f32 %v3362_v21, %v3423_v41  ;;  %v1689_v18 = vadd.f32 %v3362_v21, %v1584_v30 }
 0x160   : > { %2598 = vmatpush3.xpose.msk.msra.mxu1 %vm1765_vm1, %v1745_v46  ;;  %v1756_v5 = vmax.f32 %v1692_v25, 0.0  ;;  %v1574_v3 = vadd.f32 %v3492_v60, %v3490_v11  ;;  %v1688_v41 = vadd.f32 %v3362_v21, %v1579_v17  ;;  %v1671_v11 = vadd.f32 %v3362_v21, %v3394_v42 }
 0x161   : > { %2599 = vmatprep.subr.msk.mxu1 %vm1765_vm1, %v1760_v9  ;;  %v1754_v23 = vmax.f32 %v1690_v2, 0.0  ;;  %v1738_v36 = vmax.f32 %v1674_v57, 0.0  ;;  %v1753_v28 = vmax.f32 %v1689_v18, 0.0  ;;  %v1736_v60 = vmax.f32 %v1672_v22, 0.0 }
 0x162   : > { %v1687_v58 = vadd.f32 %v3362_v21, %v1574_v3  ;;  %v1752_v46 = vmax.f32 %v1688_v41, 0.0  ;;  %v1686_v4 = vadd.f32 %v3362_v21, %v1569_v14  ;;  %v1735_v37 = vmax.f32 %v1671_v11, 0.0 }
 0x163   : > { %v1670_v33 = vadd.f32 %v3362_v21, %v3401_v54  ;;  %v1685_v31 = vadd.f32 %v3362_v21, %v3482_v43  ;;  %v1669_v42 = vadd.f32 %v3362_v21, %v3384_v29  ;;  %v1684_v51 = vadd.f32 %v3362_v21, %v3488_v59 }
 0x164   : > { %2600 = vmatpush3.xpose.msk.msra.mxu1 %vm1765_vm1, %v1744_v53  ;;  %v1751_v27 = vmax.f32 %v1687_v58, 0.0  ;;  %v1750_v8 = vmax.f32 %v1686_v4, 0.0  ;;  %v1668_v43 = vadd.f32 %v3362_v21, %v3391_v45  ;;  %v1683_v53 = vadd.f32 %v3362_v21, %v3471_v34 }
 0x165   : > { %2601 = vmatprep.subr.msk.mxu1 %vm1765_vm1, %v1759_v19  ;;  %v1734_v9 = vmax.f32 %v1670_v33, 0.0  ;;  %v1749_v61 = vmax.f32 %v1685_v31, 0.0  ;;  %v1733_v54 = vmax.f32 %v1669_v42, 0.0  ;;  %v1748_v16 = vmax.f32 %v1684_v51, 0.0 }
 0x166   : > { %v1667_v29 = vadd.f32 %v3362_v21, %v3376_v48  ;;  %v1732_v59 = vmax.f32 %v1668_v43, 0.0  ;;  %v1747_v19 = vmax.f32 %v1683_v53, 0.0  ;;  %v1682_v62 = vadd.f32 %v3362_v21, %v3479_v1 }
 0x167   : > { %v1666_v34 = vadd.f32 %v3362_v21, %v3380_v20  ;;  %v2112_v49 = vlaneseq  ;;  %v1764_v0 = vstv %s1763_s15 }
 0x168   : > { %2602 = vmatpush3.xpose.msk.msra.mxu1 %vm1765_vm1, %v1743_v35  ;;  %v1731_v45 = vmax.f32 %v1667_v29, 0.0  ;;  %v1746_v24 = vmax.f32 %v1682_v62, 0.0  ;;  %v2929_v35 = vmov 1966171168  }
 0x169   : > { %2603 = vmatprep.subr.msk.mxu1 %vm1765_vm1, %v1758_v10  ;;  %v1730_v48 = vmax.f32 %v1666_v34, 0.0  ;;  %v2110_v52 = vunpack.c.l.s4 %v2929_v35  ;;  %v2113_v32 = vshrl.u32 %v2112_v49, 7  ;;  %vm2134_vm2 = vcmp.lt.s32.totalorder %v2112_v49, 512 }
 0x16b   : > { %v2111_v12 = vunpack.c.0.s8 %v2110_v52 }
 0x16c   : > { %2604 = vmatpush3.xpose.msk.msra.mxu1 %vm1765_vm1, %v1742_v39 }
 0x16d   : > { %2605 = vmatprep.subr.msk.mxu1 %vm1765_vm1, %v1757_v38 }
 0x170   : > { %2606 = vmatpush3.xpose.msk.msra.mxu1 %vm1765_vm1, %v1741_v50  ;;  %v2114_v50 = vsub.s32 %v2111_v12, %v2113_v32 }
 0x171   : > { %2607 = vmatprep.subr.msk.mxu1 %vm1765_vm1, %v1756_v5 }
 0x174   : > { %2608 = vmatpush3.xpose.msk.msra.mxu1 %vm1765_vm1, %v1740_v26 }
 0x175   : > { %2609 = vmatprep.subr.msk.mxu1 %vm1765_vm1, %v1755_v55 }
 0x178   : > { %2610 = vmatpush3.xpose.msk.msra.mxu1 %vm1765_vm1, %v1739_v56 }
 0x179   : > { %2611 = vmatprep.subr.msk.mxu1 %vm1765_vm1, %v1754_v23 }
 0x17c   : > { %2612 = vmatpush3.xpose.msk.msra.mxu1 %vm1765_vm1, %v1738_v36 }
 0x17d   : > { %2613 = vmatprep.subr.msk.mxu1 %vm1765_vm1, %v1753_v28 }
 0x180   : > { %2614 = vmatpush3.xpose.msk.msra.mxu1 %vm1765_vm1, %v1737_v15 }
 0x181   : > { %2615 = vmatprep.subr.msk.mxu1 %vm1765_vm1, %v1752_v46 }
 0x184   : > { %2616 = vmatpush3.xpose.msk.msra.mxu1 %vm1765_vm1, %v1736_v60 }
 0x185   : > { %2617 = vmatprep.subr.msk.mxu1 %vm1765_vm1, %v1751_v27 }
 0x188   : > { %2618 = vmatpush3.xpose.msk.msra.mxu1 %vm1765_vm1, %v1735_v37 }
 0x189   : > { %2619 = vmatprep.subr.msk.mxu1 %vm1765_vm1, %v1750_v8 }
 0x18c   : > { %2620 = vmatpush3.xpose.msk.msra.mxu1 %vm1765_vm1, %v1734_v9 }
 0x18d   : > { %2621 = vmatprep.subr.msk.mxu1 %vm1765_vm1, %v1749_v61 }
 0x190   : > { %2622 = vmatpush3.xpose.msk.msra.mxu1 %vm1765_vm1, %v1733_v54 }
 0x191   : > { %2623 = vmatprep.subr.msk.mxu1 %vm1765_vm1, %v1748_v16 }
 0x194   : > { %2624 = vmatpush3.xpose.msk.msra.mxu1 %vm1765_vm1, %v1732_v59 }
 0x195   : > { %2625 = vmatprep.subr.msk.mxu1 %vm1765_vm1, %v1747_v19 }
 0x198   : > { %2626 = vmatpush3.xpose.msk.msra.mxu1 %vm1765_vm1, %v1731_v45 }
 0x199   : > { %2627 = vmatprep.subr.msk.mxu1 %vm1765_vm1, %v1746_v24 }
 0x19c   : > { %2628 = vmatpush3.xpose.msk.msra.mxu1 %vm1765_vm1, %v1730_v48 }
 0x19f   : > { %2630 = vmatmul.mubr.msk.f32.vlgmr.msra.gmra.mxu1 %vm1765_vm1, %v3369_v40 }
 0x21f   : > { %v2027_v1 = vpop.f32.mrf.mxu0 }
 0x220   : > { %v2028_v21 = vadd.f32 %v2027_v1, %v1764_v0 }
 0x221   : > { %v2029_v10 = vpop.f32.mrf.mxu0 }
 0x222   : > { %v2030_v20 = vadd.f32 %v2029_v10, %v1764_v0 }
 0x224   : > { %v2107_v25 = vcombine.low %v2028_v21, %v2030_v20 }
 0x226   : > { %v2115_v44 = vrot.slane %v2107_v25, %v2114_v50 }
 0x25f   : > { %v2098_v39 = vpop.f32.mrf.mxu1 }
 0x260   : > { %v2099_v38 = vadd.f32 %v2098_v39, %v1764_v0 }
 0x261   : > { %v2100_v47 = vpop.f32.mrf.mxu1 }
 0x262   : > { %v2101_v40 = vadd.f32 %v2100_v47, %v1764_v0 }
 0x264   : > { %v2108_v13 = vcombine.low %v2099_v38, %v2101_v40 }
 0x266   : > { %v2122_v7 = vrot.slane %v2108_v13, %v2114_v50 }
 0x268   : > { %v2123_v5 = vcombine.low %v2115_v44, %v2122_v7 }
 0x26a   : > { %v2130_v6 = vrot.slane %v2123_v5, %v2114_v50 }
 0x26c   : > { %2136 = vst.msk [vmem:[%s313_s19] sm:$0xf] %vm2134_vm2, %v2130_v6 }
 0x26d   : > { %2880 = shalt.err (!%p2877_p3)
}
 0x26e   : > { %s2881_s10 = scalar_lea.hbm %s2150_s23, 64  ;;  %s2885_s15 = scalar_lea.hbm %s3692_s7, 256 }
 0x26f   : > { %p2882_p4 = scmp.ne.s32.totalorder %s2150_s23, %s2881_s10  ;;  %p2886_p9 = scmp.lt.s32.totalorder %s2150_s23, %s3692_s7 }
 0x270   : > { %p2887_p10 = scmp.lt.s32.totalorder %s2885_s15, %s2881_s10 }
 0x271   : > { %p2883_p7 = pnand %p2882_p4, %p3009_p5 }
 0x272   : > { %p2888_p11 = por %p2887_p10, %p2886_p9 }
 0x273   : > { %p2884_p8 = pneg %p2883_p7 }
 0x275   : > { %p2889_p12 = pnand %p2888_p11, %p2884_p8 }
 0x277   : > { %2892 = shalt.err (!%p2889_p12)
}
 0x278   : > { %2827 = dma.vmem_to_hbm [thread:$0]  (%p3009_p5), %s2153_s20, 64, %s2150_s23, %s2138_s24  }
 0x279 PF: > { %p2833_p13 = scmp.ge.s32.totalorder %s2927_s29, 2  ;;  %s2164_s19 = sand.u32 1, %s2915_s26  }
 0x27a   : > { %s2165_s21 = scalar_lea.sflag [#allocation4], %s2164_s19 }
 0x27b   : > { %p2830_p0 = pnand %p2833_p13, %p3013_p6 }
 0x27d   : > { %p2831_p1 = pneg %p2830_p0 }
 0x27f   : > { %2910 = dma.done.wait (%p2831_p1), %s2165_s21, 64  }
 0x280   : > { %2912 = vsyncadd (%p2831_p1), %s2165_s21, 4294967232  ;;  %p18_p2 = scmp.ge.s32.totalorder %s2997_s8, 6   ;;  %s3695_s26 = smov %s2919_s27 }
 0x281   : > { %s3696_s27 = smov %s2923_s28  ;;  %s3697_s28 = smov %s3007_s11 }
 0x282   : > { %s3698_s29 = smov %s2997_s8  ;;  %20 = sbr.rel (!%p18_p2) target bundleno = 5 (0x5), region = 86 }
 0x287   :  { %2170 = vsyncpa [#allocation4], 1 }
 0x288   :  { %2172 = vsyncpa [#allocation4 + $0x1], 1 }

</bundles_post_ra>
